<compile_context>
chip_gen: v7x
topology: tpu7x:2x2x1
jax: 0.10.0
libtpu: 0.0.40
codegen_flags: <defaults>
</compile_context>

<pallas_src>
import functools
import math

import jax
import jax.numpy as jnp
from jax.experimental import pallas as pl
from jax.experimental.pallas import tpu as pltpu


def _round_up(x: int, m: int) -> int:
    return ((x + m - 1) // m) * m


def _cdiv(a: int, b: int) -> int:
    return (a + b - 1) // b


def _device_has_big_vmem() -> bool:
    """True on v5e/v6e (128 MiB VMEM, single TensorCore); False (conservative,
    v7x-safe: 64 MiB VMEM, 2 TensorCores) otherwise / when unknown."""
    try:
        kind = jax.devices()[0].device_kind.lower()
    except Exception:
        return False
    return ("v5" in kind) or ("v6" in kind)


# ---------------------------------------------------------------------------
# Kernels
# ---------------------------------------------------------------------------

def _hidden_kernel_inplace(x_ref, w_ref, o_ref):
    """Accumulate x @ W^T directly into the resident f32 output block; apply
    tanh in place on the last reduction step (no separate accumulator)."""
    @pl.when(pl.program_id(2) == 0)
    def _init():
        o_ref[...] = jnp.zeros_like(o_ref)

    # x_ref: (TM, TK) bf16/f32, w_ref: (TK, TN) bf16/f32 -> MXU, f32 accumulate.
    o_ref[...] += jnp.dot(x_ref[...], w_ref[...],
                          preferred_element_type=jnp.float32)

    @pl.when(pl.program_id(2) == pl.num_programs(2) - 1)
    def _finalize():
        o_ref[...] = jnp.tanh(o_ref[...])


def _hidden_kernel_scratch(x_ref, w_ref, o_ref, acc_ref):
    """Variant for narrower (e.g. bf16) output dtypes: accumulate in an f32
    VMEM scratch, cast tanh(result) into o_ref once at the end."""
    @pl.when(pl.program_id(2) == 0)
    def _init():
        acc_ref[...] = jnp.zeros_like(acc_ref)

    acc_ref[...] += jnp.dot(x_ref[...], w_ref[...],
                            preferred_element_type=jnp.float32)

    @pl.when(pl.program_id(2) == pl.num_programs(2) - 1)
    def _finalize():
        o_ref[...] = jnp.tanh(acc_ref[...]).astype(o_ref.dtype)


# ---------------------------------------------------------------------------
# Tiling policy
# ---------------------------------------------------------------------------

def _choose_nk_tiles(N, K, compute_dtype, big_vmem):
    itemsize = jnp.dtype(compute_dtype).itemsize
    tn_cap = 1024 if big_vmem else 512          # v5e/v6e: grow into 128 MiB VMEM
    tk_cap = 2048 if itemsize <= 2 else 1024    # bigger K tiles for bf16 operands
    TN = min(tn_cap, _round_up(N, 128))         # lane-dense output tiles
    TK = min(tk_cap, _round_up(K, 128))
    return TN, TK


def _choose_tm(B, n_tiles, big_vmem):
    tm_cap = 512 if big_vmem else 256
    m_tiles = _cdiv(B, tm_cap)
    # v7x has 2 TensorCores fed by the "parallel" grid axes: keep at least two
    # (i, j) tiles so neither core idles (only when the batch can be split).
    if (not big_vmem) and (m_tiles * n_tiles < 2) and B >= 16:
        m_tiles = 2
    TM = _round_up(_cdiv(B, m_tiles), 8)        # pad M only to a multiple of 8
    return TM, m_tiles


# ---------------------------------------------------------------------------
# Forward
# ---------------------------------------------------------------------------

@functools.partial(
    jax.jit,
    static_argnames=("N", "K", "TN", "TK", "compute_dtype", "out_dtype", "big_vmem"),
)
def _forward_impl(x, w_kn, *, N, K, TN, TK, compute_dtype, out_dtype, big_vmem):
    B = x.shape[0]
    Kp, Np = w_kn.shape
    TM, m_tiles = _choose_tm(B, Np // TN, big_vmem)
    Bp = m_tiles * TM

    # Cast once in the wrapper (operands are DMA'd already in compute_dtype),
    # then zero-pad: zeros along K contribute nothing to the dot; padded M/N
    # rows/cols are sliced off below (tanh(0) = 0 anyway).
    x = x.astype(compute_dtype)
    if (Bp, Kp) != (B, K):
        x = jnp.pad(x, ((0, Bp - B), (0, Kp - K)))

    grid = (m_tiles, Np // TN, Kp // TK)

    if jnp.dtype(out_dtype) == jnp.float32:
        kernel = _hidden_kernel_inplace
        scratch_shapes = []
    else:
        kernel = _hidden_kernel_scratch
        scratch_shapes = [pltpu.VMEM((TM, TN), jnp.float32)]

    out = pl.pallas_call(
        kernel,
        out_shape=jax.ShapeDtypeStruct((Bp, Np), out_dtype),
        grid_spec=pltpu.PrefetchScalarGridSpec(
            num_scalar_prefetch=0,
            grid=grid,
            in_specs=[
                # x tile: (batch tile i, reduction tile k)
                pl.BlockSpec((TM, TK), lambda i, j, k: (i, k)),
                # W^T tile: (reduction tile k, output tile j) — MXU-native (K, N).
                pl.BlockSpec((TK, TN), lambda i, j, k: (k, j)),
            ],
            # Output block index constant across k -> resident accumulator,
            # written back to HBM once per (i, j).
            out_specs=pl.BlockSpec((TM, TN), lambda i, j, k: (i, j)),
            scratch_shapes=scratch_shapes,
        ),
        compiler_params=pltpu.CompilerParams(
            dimension_semantics=("parallel", "parallel", "arbitrary"),
            vmem_limit_bytes=(64 if big_vmem else 32) * 1024 * 1024,
        ),
    )(x, w_kn)

    if (Bp, Np) != (B, N):
        out = out[:B, :N]
    return out


class HiddenLayerPallas:
    """Pallas port of the PyTorch `hiddenlayer` forward: tanh(x @ W^T).

    The weight (PyTorch nn.Linear layout: (no_output, no_input)) is cast,
    transposed to (K, N) and padded ONCE at construction, so per-forward work
    is just: cast/pad x -> pallas_call -> slice.
    """

    def __init__(self, weight, *, compute_dtype=jnp.bfloat16, out_dtype=jnp.float32):
        self.N, self.K = weight.shape
        self.compute_dtype = jnp.dtype(compute_dtype)
        self.out_dtype = jnp.dtype(out_dtype)
        self.big_vmem = _device_has_big_vmem()
        self.TN, self.TK = _choose_nk_tiles(self.N, self.K,
                                            self.compute_dtype, self.big_vmem)
        Np = _round_up(self.N, self.TN)
        Kp = _round_up(self.K, self.TK)
        w_kn = jnp.asarray(weight).astype(self.compute_dtype).T        # (K, N)
        self.w_kn = jnp.pad(w_kn, ((0, Kp - self.K), (0, Np - self.N)))

    def __call__(self, x):
        return _forward_impl(
            x, self.w_kn,
            N=self.N, K=self.K, TN=self.TN, TK=self.TK,
            compute_dtype=self.compute_dtype, out_dtype=self.out_dtype,
            big_vmem=self.big_vmem,
        )


def hiddenlayer_forward(x, weight, *, compute_dtype=jnp.bfloat16,
                        out_dtype=jnp.float32):
    """Convenience one-shot API (weight in PyTorch (no_output, no_input) layout)."""
    return HiddenLayerPallas(weight, compute_dtype=compute_dtype,
                             out_dtype=out_dtype)(x)


def xavier_normal_weight(key, no_output, no_input, gain=0.01):
    # Matches torch.nn.init.xavier_normal_: std = gain * sqrt(2 / (fan_in + fan_out))
    std = gain * math.sqrt(2.0 / (no_input + no_output))
    return std * jax.random.normal(key, (no_output, no_input), dtype=jnp.float32)


# TODO(synk): recCorr() correlation tracking, the SGD optimizer state and
# adaptLr in the PyTorch module are training-time bookkeeping, not part of the
# forward pass, and are not translated here.

if __name__ == "__main__":
    key = jax.random.PRNGKey(0)
    k_x, k_w, k_x2, k_w2, k_x3, k_w3 = jax.random.split(key, 6)

    # ---- small shape matching the original module's toy usage (exact f32) ----
    batch, no_input, no_output = 8, 32, 16
    x = jax.random.normal(k_x, (batch, no_input), dtype=jnp.float32)
    W = xavier_normal_weight(k_w, no_output, no_input, gain=0.01)

    layer_f32 = HiddenLayerPallas(W, compute_dtype=jnp.float32)
    out = jax.block_until_ready(layer_f32(x))
    ref = jnp.tanh(x @ W.T)
    assert out.shape == (batch, no_output)
    assert jnp.allclose(out, ref, atol=1e-5, rtol=1e-5)

    # ---- larger shape: real tiling / K-accumulation / megacore sharding ----
    B2, K2, N2 = 512, 1024, 256
    x2 = jax.random.normal(k_x2, (B2, K2), dtype=jnp.float32)
    W2 = xavier_normal_weight(k_w2, N2, K2, gain=0.01)
    ref2 = jnp.tanh(x2 @ W2.T)

    out2_f32 = jax.block_until_ready(
        HiddenLayerPallas(W2, compute_dtype=jnp.float32)(x2))
    assert out2_f32.shape == (B2, N2)
    assert jnp.allclose(out2_f32, ref2, atol=1e-4, rtol=1e-4)

    # bf16 MXU operands (cast once in HBM), f32 accumulation + f32 tanh.
    layer_bf16 = HiddenLayerPallas(W2, compute_dtype=jnp.bfloat16)
    out2_bf16 = jax.block_until_ready(layer_bf16(x2))
    assert jnp.allclose(out2_bf16, ref2, atol=1e-3, rtol=2e-2)

    # bf16 output path (f32 scratch accumulator, halved writeback bandwidth).
    layer_bf16_out = HiddenLayerPallas(W2, compute_dtype=jnp.bfloat16,
                                       out_dtype=jnp.bfloat16)
    out2_bf16_out = jax.block_until_ready(layer_bf16_out(x2))
    assert out2_bf16_out.dtype == jnp.bfloat16
    assert jnp.allclose(out2_bf16_out.astype(jnp.float32), ref2,
                        atol=2e-3, rtol=2e-2)

    # ---- uneven shape: exercises cdiv-based TM, K/N padding, row slicing ----
    B3, K3, N3 = 300, 200, 48
    x3 = jax.random.normal(k_x3, (B3, K3), dtype=jnp.float32)
    W3 = xavier_normal_weight(k_w3, N3, K3, gain=0.01)
    out3 = jax.block_until_ready(
        HiddenLayerPallas(W3, compute_dtype=jnp.float32)(x3))
    ref3 = jnp.tanh(x3 @ W3.T)
    assert out3.shape == (B3, N3)
    assert jnp.allclose(out3, ref3, atol=1e-5, rtol=1e-5)

    print("KERNEL_OK")
</pallas_src>

<mosaic_0001>
module attributes {stable_mosaic.version = 11 : i64} {
  func.func @_hidden_kernel_inplace(%arg0: i32, %arg1: i32, %arg2: i32, %arg3: memref<8x128xf32, #tpu.memory_space<vmem>>, %arg4: memref<128x128xf32, #tpu.memory_space<vmem>>, %arg5: memref<8x128xf32, #tpu.memory_space<vmem>>) attributes {dimension_semantics = [#tpu.dimension_semantics<parallel>, #tpu.dimension_semantics<parallel>, #tpu.dimension_semantics<arbitrary>], iteration_bounds = array<i64: 1, 1, 1>, scalar_prefetch = 0 : i64, scratch_operands = 0 : i64, tpu.core_type = #tpu.core_type<tc>, window_params = [{transform_indices = @transform_0, window_bounds = array<i64: 8, 128>}, {transform_indices = @transform_1, window_bounds = array<i64: 128, 128>}, {transform_indices = @transform_2, window_bounds = array<i64: 8, 128>}]} {
    %c0_i32 = arith.constant 0 : i32
    %0 = arith.cmpi eq, %arg2, %c0_i32 : i32
    %1 = arith.extui %0 : i1 to i32
    %c0_i32_0 = arith.constant 0 : i32
    %2 = arith.cmpi ne, %1, %c0_i32_0 : i32
    scf.if %2 {
      %cst_10 = arith.constant 0.000000e+00 : f32
      %12 = vector.broadcast %cst_10 : f32 to vector<8x128xf32>
      %c0_11 = arith.constant 0 : index
      %c0_12 = arith.constant 0 : index
      %13 = vector.load %arg5[%c0_11, %c0_12] : memref<8x128xf32, #tpu.memory_space<vmem>>, vector<8x128xf32>
      tpu.vector_store %arg5[%c0_11, %c0_12], %12 {strides = array<i32>} : memref<8x128xf32, #tpu.memory_space<vmem>>, vector<8x128xf32>,
    } else {
    }
    %c0 = arith.constant 0 : index
    %c0_1 = arith.constant 0 : index
    %3 = vector.load %arg5[%c0, %c0_1] : memref<8x128xf32, #tpu.memory_space<vmem>>, vector<8x128xf32>
    %c0_2 = arith.constant 0 : index
    %c0_3 = arith.constant 0 : index
    %4 = vector.load %arg3[%c0_2, %c0_3] : memref<8x128xf32, #tpu.memory_space<vmem>>, vector<8x128xf32>
    %c0_4 = arith.constant 0 : index
    %c0_5 = arith.constant 0 : index
    %5 = vector.load %arg4[%c0_4, %c0_5] : memref<128x128xf32, #tpu.memory_space<vmem>>, vector<128x128xf32>
    %cst = arith.constant dense<0.000000e+00> : vector<8x128xf32>
    %6 = tpu.matmul %4, %5, %cst {dimension_numbers = #tpu.dot_dimension_numbers<[1], [0], [0], [1], [0, 0, 1, 1], [], []>} : vector<8x128xf32>, vector<128x128xf32>, vector<8x128xf32> -> vector<8x128xf32>
    %7 = arith.addf %3, %6 : vector<8x128xf32>
    %c0_6 = arith.constant 0 : index
    %c0_7 = arith.constant 0 : index
    %8 = vector.load %arg5[%c0_6, %c0_7] : memref<8x128xf32, #tpu.memory_space<vmem>>, vector<8x128xf32>
    tpu.vector_store %arg5[%c0_6, %c0_7], %7 {strides = array<i32>} : memref<8x128xf32, #tpu.memory_space<vmem>>, vector<8x128xf32>,
    %c0_i32_8 = arith.constant 0 : i32
    %9 = arith.cmpi eq, %arg2, %c0_i32_8 : i32
    %10 = arith.extui %9 : i1 to i32
    %c0_i32_9 = arith.constant 0 : i32
    %11 = arith.cmpi ne, %10, %c0_i32_9 : i32
    scf.if %11 {
      %c0_10 = arith.constant 0 : index
      %c0_11 = arith.constant 0 : index
      %12 = vector.load %arg5[%c0_10, %c0_11] : memref<8x128xf32, #tpu.memory_space<vmem>>, vector<8x128xf32>
      %13 = math.tanh %12 : vector<8x128xf32>
      %c0_12 = arith.constant 0 : index
      %c0_13 = arith.constant 0 : index
      %14 = vector.load %arg5[%c0_12, %c0_13] : memref<8x128xf32, #tpu.memory_space<vmem>>, vector<8x128xf32>
      tpu.vector_store %arg5[%c0_12, %c0_13], %13 {strides = array<i32>} : memref<8x128xf32, #tpu.memory_space<vmem>>, vector<8x128xf32>,
    } else {
    }
    return
  }
  func.func @transform_0(%arg0: i32, %arg1: i32, %arg2: i32) -> (i32, i32) {
    %c0_i32 = arith.constant 0 : i32
    return %arg0, %arg2 : i32, i32
  }
  func.func @transform_1(%arg0: i32, %arg1: i32, %arg2: i32) -> (i32, i32) {
    %c0_i32 = arith.constant 0 : i32
    return %arg2, %arg1 : i32, i32
  }
  func.func @transform_2(%arg0: i32, %arg1: i32, %arg2: i32) -> (i32, i32) {
    %c0_i32 = arith.constant 0 : i32
    return %arg0, %arg1 : i32, i32
  }
}

</mosaic_0001>

<bundles_post_ra>
// kernel: _forward_impl.1
= control target key start
LH: loop header
LB: loop body
LE: loop exit
PB: predicated region body
PF: predicated region fallthrough
CT: control target
= control target key end

     0   :  { %7 = vsyncpa [#allocation3], 0  ;;  %s324_s0 = inlined_call_operand.vmem [shape: f32[8,128], index: 0, kind: input, shape index: {}]   ;;  %s325_s1 = inlined_call_operand.hbm [shape: f32[128,128], index: 1, kind: input, shape index: {}]   ;;  %s326_s2 = inlined_call_operand.hbm [shape: f32[8,128], index: 2, kind: output, shape index: {}]  }
   0x1   :  { %8 = vsyncpa [#allocation4], 0  ;;  %s275_s9 = smov [#allocation2]   ;;  %s227_s13 = scalar_lea.hbm %s325_s1, 2048 }
   0x2   :  { %s16_s10 = sshll.u32 %s275_s9, 4  ;;  %p228_p0 = scmp.ne.s32.totalorder %s325_s1, %s227_s13  ;;  %s17_s10 = int_to_ptr.vmem [resolvable:$true] %s16_s10 }
   0x3   :  { %p231_p1 = scmp.lt.u32.totalorder %s227_s13, %s325_s1 }
   0x5   :  { %p233_p2 = pnand %p231_p1, %p228_p0 }
   0x7   :  { %236 = shalt.err (!%p233_p2)
}
   0x8   :  { %s237_s18 = scalar_lea.vmem %s17_s10, 2048  ;;  %p242_p4 = scmp.lt.s32.totalorder %s17_s10, %s17_s10 }
   0x9   :  { %p238_p3 = scmp.ne.s32.totalorder %s17_s10, %s237_s18  ;;  %p243_p5 = scmp.lt.s32.totalorder %s237_s18, %s237_s18 }
   0xb   :  { %p244_p6 = por %p243_p5, %p242_p4 }
   0xd   :  { %p245_p7 = pnand %p244_p6, %p238_p3 }
   0xf   :  { %248 = shalt.err (!%p245_p7)
}
  0x10   :  { %s276_s19 = smov 128   ;;  %s277_s20 = smov 8  }
  0x11   :  { %22 = dma.hbm_to_vmem [thread:$0]  %s325_s1, 2048, %s17_s10, [#allocation3], %s276_s19, %s276_s19, %s277_s20  }
  0x12   :  { %271 = dma.done.wait [#allocation3], 2048  }
  0x13   :  { %272 = vsyncadd [#allocation3], 4294965248  ;;  %v278_v0 = vmov 0.0|0.0   ;;  %vm279_vm0 = vmmov 0   ;;  %v280_v1 = vmov 0.0   ;;  %v33_v2 = vld [vmem:[#allocation2] sm:$0xff] }
  0x14   :  { %194 = vmatprep.subr.bf16.mxu0 %v278_v0  ;;  %191 = vmatprep.mubr.msk.f32.mxu0 %vm279_vm0, %v280_v1  ;;  %v34_v3 = vld [vmem:[#allocation2 + $0x8] sm:$0xff]  ;;  %v35_v4 = vld [vmem:[#allocation2 + $0x10] sm:$0xff]  ;;  %v36_v6 = vld [vmem:[#allocation2 + $0x18] sm:$0xff]  ;;  %s281_s24 = smov [#allocation5]  }
  0x15   :  { %v195_v5 = vpack.c.bf16 %v34_v3, %v33_v2  ;;  %v198_v7 = vpack.c.bf16 %v36_v6, %v35_v4  ;;  %v37_v8 = vld [vmem:[#allocation2 + $0x20] sm:$0xff]  ;;  %v38_v9 = vld [vmem:[#allocation2 + $0x28] sm:$0xff]  ;;  %v39_v11 = vld [vmem:[#allocation2 + $0x30] sm:$0xff]  ;;  %s133_s25 = sshll.u32 %s281_s24, 4  ;;  %s134_s25 = int_to_ptr.vmem [resolvable:$true] %s133_s25 }
  0x16   :  { %v201_v10 = vpack.c.bf16 %v38_v9, %v37_v8  ;;  %v40_v12 = vld [vmem:[#allocation2 + $0x38] sm:$0xff]  ;;  %v41_v14 = vld [vmem:[#allocation2 + $0x40] sm:$0xff]  ;;  %v42_v15 = vld [vmem:[#allocation2 + $0x48] sm:$0xff]  ;;  %s249_s26 = scalar_lea.vmem %s134_s25, 128  ;;  %p254_p9 = scmp.lt.s32.totalorder %s134_s25, %s134_s25 }
  0x17   :  { %196 = vmatpush3.bf16.msra.mxu0 %v195_v5  ;;  %v204_v13 = vpack.c.bf16 %v40_v12, %v39_v11  ;;  %v207_v16 = vpack.c.bf16 %v42_v15, %v41_v14  ;;  %v43_v17 = vld [vmem:[#allocation2 + $0x50] sm:$0xff]  ;;  %v44_v18 = vld [vmem:[#allocation2 + $0x58] sm:$0xff]  ;;  %v45_v20 = vld [vmem:[#allocation2 + $0x60] sm:$0xff]  ;;  %p250_p8 = scmp.ne.s32.totalorder %s134_s25, %s249_s26  ;;  %p255_p10 = scmp.lt.s32.totalorder %s249_s26, %s249_s26 }
  0x18   :  { %197 = vmatprep.subr.bf16.mxu0 %v278_v0  ;;  %v210_v19 = vpack.c.bf16 %v44_v18, %v43_v17  ;;  %v46_v21 = vld [vmem:[#allocation2 + $0x68] sm:$0xff]  ;;  %v47_v23 = vld [vmem:[#allocation2 + $0x70] sm:$0xff]  ;;  %v48_v24 = vld [vmem:[#allocation2 + $0x78] sm:$0xff] }
  0x19   :  { %v213_v22 = vpack.c.bf16 %v46_v21, %v45_v20  ;;  %v216_v25 = vpack.c.bf16 %v48_v24, %v47_v23  ;;  %v32_v26 = vld [vmem:[%s324_s0] sm:$0xff]  ;;  %p256_p11 = por %p255_p10, %p254_p9 }
  0x1b   :  { %199 = vmatpush3.bf16.msra.mxu0 %v198_v7  ;;  %p257_p12 = pnand %p256_p11, %p250_p8 }
  0x1c   :  { %200 = vmatprep.subr.bf16.mxu0 %v278_v0 }
  0x1f   :  { %202 = vmatpush3.bf16.msra.mxu0 %v201_v10 }
  0x20   :  { %203 = vmatprep.subr.bf16.mxu0 %v278_v0 }
  0x23   :  { %205 = vmatpush3.bf16.msra.mxu0 %v204_v13 }
  0x24   :  { %206 = vmatprep.subr.bf16.mxu0 %v278_v0 }
  0x27   :  { %208 = vmatpush3.bf16.msra.mxu0 %v207_v16 }
  0x28   :  { %209 = vmatprep.subr.bf16.mxu0 %v278_v0 }
  0x2b   :  { %211 = vmatpush3.bf16.msra.mxu0 %v210_v19 }
  0x2c   :  { %212 = vmatprep.subr.bf16.mxu0 %v278_v0 }
  0x2f   :  { %214 = vmatpush3.bf16.msra.mxu0 %v213_v22 }
  0x30   :  { %215 = vmatprep.subr.bf16.mxu0 %v278_v0 }
  0x33   :  { %217 = vmatpush3.bf16.msra.mxu0 %v216_v25 }
  0x36   :  { %192 = vmatmul.mubr.f32.vlgmr.msra.gmra.mrb[0].mxu0 %v32_v26 }
 0x109   :  { %v115_v27 = vpop.f32.mrb[0].mxu0 }
 0x10a   :  { %v193_v28 = vpop.f32.mrb[1].mxu0  ;;  %225 = vtanh.f32 %v115_v27 }
 0x114   :  { %v226_v29 = vpop.eup %225 }
 0x115   :  { %126 = vst [vmem:[#allocation5] sm:$0xff] %v226_v29 }
 0x116   :  { %260 = shalt.err (!%p257_p12)
}
 0x117   :  { %s261_s0 = scalar_lea.hbm %s326_s2, 128 }
 0x118   :  { %p262_p13 = scmp.ne.s32.totalorder %s326_s2, %s261_s0  ;;  %p265_p0 = scmp.lt.u32.totalorder %s261_s0, %s326_s2 }
 0x11a   :  { %p267_p1 = pnand %p265_p0, %p262_p13 }
 0x11c   :  { %270 = shalt.err (!%p267_p1)
}
 0x11d   :  { %136 = dma.vmem_to_hbm [thread:$0]  %s134_s25, 128, %s326_s2, [#allocation4]  }
 0x11e   :  { %273 = dma.done.wait [#allocation4], 128  }
 0x11f   :  { %274 = vsyncadd [#allocation4], 4294967168 }
 0x120   :  { %140 = vsyncpa [#allocation3], 1 }
 0x121   :  { %141 = vsyncpa [#allocation4], 1 }

</bundles_post_ra>
